<compile_context>
chip_gen: v7x
topology: tpu7x:2x2x1
jax: 0.10.0
libtpu: 0.0.40
codegen_flags: <defaults>
</compile_context>

<pallas_src>
import functools

import jax
import jax.numpy as jnp
from jax.experimental import pallas as pl
from jax.experimental.pallas import tpu as pltpu


# ------------------------------ kernels --------------------------------------

def _ln_kernel_withbias(x_ref, w_ref, b_ref, o_ref, *, eps):
    # x_ref block: (1, C, ...); channel axis is axis 0 of x_ref[0].
    # Two-pass (centered) variance — keep the numerically robust form here.
    x = x_ref[0].astype(jnp.float32)
    w = w_ref[...].astype(jnp.float32)
    b = b_ref[...].astype(jnp.float32)
    mu = jnp.mean(x, axis=0, keepdims=True)
    xc = x - mu
    var = jnp.mean(xc * xc, axis=0, keepdims=True)      # unbiased=False
    inv = jax.lax.rsqrt(var + eps)
    o_ref[0] = (xc * inv * w + b).astype(o_ref.dtype)


def _ln_kernel_biasfree(x_ref, w_ref, o_ref, *, eps):
    # BiasFree: uncentered numerator; single-pass var = E[x^2] - mu^2 removes
    # the centered (C, T) temporary and overlaps the two reductions.
    x = x_ref[0].astype(jnp.float32)
    w = w_ref[...].astype(jnp.float32)
    mu = jnp.mean(x, axis=0, keepdims=True)
    ms = jnp.mean(x * x, axis=0, keepdims=True)
    var = ms - mu * mu
    inv = jax.lax.rsqrt(var + eps)
    o_ref[0] = (x * inv * w).astype(o_ref.dtype)


# --------------------------- tiling helpers -----------------------------------

_BLOCK_BUDGET_BYTES = 4 * 1024 * 1024    # physical bytes per block
_VMEM_LIMIT_BYTES = 32 * 1024 * 1024     # 4 live blocks (2 in + 2 out) + slack


def _sublane_multiple(dtype):
    itemsize = jnp.dtype(dtype).itemsize
    return max(8, 32 // max(1, itemsize))   # 8 f32, 16 bf16, 32 int8


def _round_up(v, m):
    return ((v + m - 1) // m) * m


def _cdiv(a, b):
    return -(-a // b)


# ------------------------------ wrapper ---------------------------------------

def layernorm_nchw(x, weight, bias=None, *, layernorm_type="WithBias", eps=1e-5):
    """Forward pass of LayerNorm(dim, LayerNorm_type) on NCHW input."""
    b, c, h, w = x.shape
    hw = h * w
    with_bias = layernorm_type != "BiasFree"
    if with_bias and bias is None:
        raise ValueError("WithBias LayerNorm requires a bias parameter.")

    itemsize = jnp.dtype(x.dtype).itemsize
    sub = _sublane_multiple(x.dtype)

    use_outer_c = (hw % 128 == 0)

    if use_outer_c:
        # --- Path A: (B, C, S, 128) view; channel reduction over an OUTER axis.
        s_total = hw // 128
        x_v = x.reshape(b, c, s_total, 128)

        bytes_per_s = c * 128 * itemsize                    # dense: C outer dim
        max_st = max(sub, (_BLOCK_BUDGET_BYTES // max(1, bytes_per_s)) // sub * sub)
        if max_st >= s_total:
            n_tiles = 1
        else:
            n_tiles = _cdiv(s_total, max_st)
        # v7x megacore: if batch can't be sharded, split the spatial axis.
        if b == 1 and n_tiles == 1 and s_total >= 2 * sub:
            n_tiles = 2
        if n_tiles == 1:
            s_t = s_total
        else:
            s_t = min(_round_up(_cdiv(s_total, n_tiles), sub), s_total)
        grid = (b, _cdiv(s_total, s_t))

        x_spec = pl.BlockSpec((1, c, s_t, 128), lambda bi, ti: (bi, 0, ti, 0))
        out_spec = pl.BlockSpec((1, c, s_t, 128), lambda bi, ti: (bi, 0, ti, 0))
        p_spec = pl.BlockSpec((c, 1, 1), lambda bi, ti: (0, 0, 0))
        w_p = weight.reshape(c, 1, 1)
        b_p = bias.reshape(c, 1, 1) if with_bias else None
        out_shape = jax.ShapeDtypeStruct((b, c, s_total, 128), x.dtype)
    else:
        # --- Path B (fallback, ragged H*W): (B, C, HW) view; sublane reduction.
        x_v = x.reshape(b, c, hw)

        c_pad = _round_up(c, sub)                           # physical sublanes
        max_t = (_BLOCK_BUDGET_BYTES // max(1, c_pad * itemsize)) // 128 * 128
        max_t = max(512, max_t)                             # keep DMA rows >= 2 KiB
        if max_t >= hw:
            n_tiles = 1
        else:
            n_tiles = _cdiv(hw, max_t)
        if b == 1 and n_tiles == 1 and hw >= 256:
            n_tiles = 2
        if n_tiles == 1:
            t_hw = hw
        else:
            t_hw = min(_round_up(_cdiv(hw, n_tiles), 128), hw)
        grid = (b, _cdiv(hw, t_hw))

        x_spec = pl.BlockSpec((1, c, t_hw), lambda bi, ti: (bi, 0, ti))
        out_spec = pl.BlockSpec((1, c, t_hw), lambda bi, ti: (bi, 0, ti))
        p_spec = pl.BlockSpec((c, 1), lambda bi, ti: (0, 0))
        w_p = weight.reshape(c, 1)
        b_p = bias.reshape(c, 1) if with_bias else None
        out_shape = jax.ShapeDtypeStruct((b, c, hw), x.dtype)

    if with_bias:
        kernel = functools.partial(_ln_kernel_withbias, eps=eps)
        in_specs = [x_spec, p_spec, p_spec]
        args = (x_v, w_p, b_p)
    else:
        kernel = functools.partial(_ln_kernel_biasfree, eps=eps)
        in_specs = [x_spec, p_spec]
        args = (x_v, w_p)

    param_bytes = sum(int(a.size) * jnp.dtype(a.dtype).itemsize for a in args[1:])
    cost = pl.CostEstimate(
        flops=6 * b * c * hw,
        transcendentals=b * hw,                       # one rsqrt per spatial position
        bytes_accessed=2 * b * c * hw * itemsize + param_bytes,
    )

    out = pl.pallas_call(
        kernel,
        out_shape=out_shape,
        grid_spec=pltpu.PrefetchScalarGridSpec(
            num_scalar_prefetch=0,
            grid=grid,
            in_specs=in_specs,
            out_specs=out_spec,
        ),
        compiler_params=pltpu.CompilerParams(
            dimension_semantics=("parallel", "parallel"),
            vmem_limit_bytes=_VMEM_LIMIT_BYTES,
        ),
        cost_estimate=cost,
    )(*args)

    return out.reshape(b, c, h, w)


# ------------------------------ reference -------------------------------------

def _reference(x, weight, bias, layernorm_type):
    # Pure-JAX reference mirroring the PyTorch module (to_3d / body / to_4d).
    b, c, h, w = x.shape
    x3 = jnp.transpose(x, (0, 2, 3, 1)).reshape(b, h * w, c).astype(jnp.float32)
    mu = jnp.mean(x3, axis=-1, keepdims=True)
    var = jnp.mean((x3 - mu) ** 2, axis=-1, keepdims=True)
    if layernorm_type == "BiasFree":
        y3 = x3 / jnp.sqrt(var + 1e-5) * weight
    else:
        y3 = (x3 - mu) / jnp.sqrt(var + 1e-5) * weight + bias
    return y3.reshape(b, h, w, c).transpose(0, 3, 1, 2).astype(x.dtype)


if __name__ == "__main__":
    ok = True

    # Primary shape (module-consistent small NCHW): exercises the outer-C path.
    B, C, H, W = 2, 4, 16, 16
    x = jax.random.normal(jax.random.PRNGKey(0), (B, C, H, W), dtype=jnp.float32)
    weight = jnp.ones((C,), jnp.float32)     # nn.Parameter(torch.ones)
    bias = jnp.zeros((C,), jnp.float32)      # nn.Parameter(torch.zeros)
    for ln_type in ("WithBias", "BiasFree"):
        y = jax.block_until_ready(layernorm_nchw(x, weight, bias, layernorm_type=ln_type))
        y_ref = _reference(x, weight, bias, ln_type)
        if not jnp.allclose(y, y_ref, atol=2e-5, rtol=2e-5):
            ok = False

    # Ragged spatial extent (H*W % 128 != 0): exercises the sublane fallback path.
    B2, C2, H2, W2 = 1, 8, 15, 15
    x2 = jax.random.normal(jax.random.PRNGKey(1), (B2, C2, H2, W2), dtype=jnp.float32)
    w2 = jax.random.normal(jax.random.PRNGKey(2), (C2,), dtype=jnp.float32)
    b2 = jax.random.normal(jax.random.PRNGKey(3), (C2,), dtype=jnp.float32)
    for ln_type in ("WithBias", "BiasFree"):
        y = jax.block_until_ready(layernorm_nchw(x2, w2, b2, layernorm_type=ln_type))
        y_ref = _reference(x2, w2, b2, ln_type)
        if not jnp.allclose(y, y_ref, atol=2e-5, rtol=2e-5):
            ok = False

    if ok:
        print("KERNEL_OK")
</pallas_src>

<mosaic_0001>
module attributes {stable_mosaic.version = 11 : i64} {
  func.func @_ln_kernel_withbias(%arg0: i32, %arg1: i32, %arg2: memref<1x4x2x128xf32, #tpu.memory_space<vmem>>, %arg3: memref<4x1x1xf32, #tpu.memory_space<vmem>>, %arg4: memref<4x1x1xf32, #tpu.memory_space<vmem>>, %arg5: memref<1x4x2x128xf32, #tpu.memory_space<vmem>>) attributes {dimension_semantics = [#tpu.dimension_semantics<parallel>, #tpu.dimension_semantics<parallel>], iteration_bounds = array<i64: 2, 1>, scalar_prefetch = 0 : i64, scratch_operands = 0 : i64, tpu.core_type = #tpu.core_type<tc>, window_params = [{transform_indices = @transform_0, window_bounds = array<i64: 1, 4, 2, 128>}, {pipeline_mode = #tpu.pipeline_mode<synchronous>, transform_indices = @transform_1, window_bounds = array<i64: 4, 1, 1>}, {pipeline_mode = #tpu.pipeline_mode<synchronous>, transform_indices = @transform_2, window_bounds = array<i64: 4, 1, 1>}, {transform_indices = @transform_3, window_bounds = array<i64: 1, 4, 2, 128>}]} {
    %c0 = arith.constant 0 : index
    %c0_0 = arith.constant 0 : index
    %c0_1 = arith.constant 0 : index
    %c0_2 = arith.constant 0 : index
    %0 = vector.load %arg2[%c0, %c0_0, %c0_1, %c0_2] : memref<1x4x2x128xf32, #tpu.memory_space<vmem>>, vector<1x4x2x128xf32>
    %1 = vector.shape_cast %0 : vector<1x4x2x128xf32> to vector<4x2x128xf32>
    %c0_3 = arith.constant 0 : index
    %c0_4 = arith.constant 0 : index
    %c0_5 = arith.constant 0 : index
    %2 = vector.load %arg3[%c0_3, %c0_4, %c0_5] : memref<4x1x1xf32, #tpu.memory_space<vmem>>, vector<4x1x1xf32>
    %c0_6 = arith.constant 0 : index
    %c0_7 = arith.constant 0 : index
    %c0_8 = arith.constant 0 : index
    %3 = vector.load %arg4[%c0_6, %c0_7, %c0_8] : memref<4x1x1xf32, #tpu.memory_space<vmem>>, vector<4x1x1xf32>
    %cst = arith.constant dense<0.000000e+00> : vector<2x128xf32>
    %4 = vector.multi_reduction <add>, %1, %cst [0] : vector<4x2x128xf32> to vector<2x128xf32>
    %5 = vector.shape_cast %4 : vector<2x128xf32> to vector<1x2x128xf32>
    %cst_9 = arith.constant 4.000000e+00 : f32
    %6 = vector.broadcast %cst_9 : f32 to vector<1x2x128xf32>
    %7 = arith.divf %5, %6 : vector<1x2x128xf32>
    %8 = vector.broadcast %7 : vector<1x2x128xf32> to vector<4x2x128xf32>
    %9 = arith.subf %1, %8 : vector<4x2x128xf32>
    %10 = arith.mulf %9, %9 : vector<4x2x128xf32>
    %cst_10 = arith.constant dense<0.000000e+00> : vector<2x128xf32>
    %11 = vector.multi_reduction <add>, %10, %cst_10 [0] : vector<4x2x128xf32> to vector<2x128xf32>
    %12 = vector.shape_cast %11 : vector<2x128xf32> to vector<1x2x128xf32>
    %cst_11 = arith.constant 4.000000e+00 : f32
    %13 = vector.broadcast %cst_11 : f32 to vector<1x2x128xf32>
    %14 = arith.divf %12, %13 : vector<1x2x128xf32>
    %cst_12 = arith.constant 9.99999974E-6 : f32
    %15 = vector.broadcast %cst_12 : f32 to vector<1x2x128xf32>
    %16 = arith.addf %14, %15 : vector<1x2x128xf32>
    %17 = math.rsqrt %16 : vector<1x2x128xf32>
    %18 = vector.broadcast %17 : vector<1x2x128xf32> to vector<4x2x128xf32>
    %19 = arith.mulf %9, %18 : vector<4x2x128xf32>
    %20 = vector.broadcast %2 : vector<4x1x1xf32> to vector<4x2x128xf32>
    %21 = arith.mulf %19, %20 : vector<4x2x128xf32>
    %22 = vector.broadcast %3 : vector<4x1x1xf32> to vector<4x2x128xf32>
    %23 = arith.addf %21, %22 : vector<4x2x128xf32>
    %c0_13 = arith.constant 0 : index
    %c0_14 = arith.constant 0 : index
    %c0_15 = arith.constant 0 : index
    %c0_16 = arith.constant 0 : index
    %24 = vector.load %arg5[%c0_13, %c0_14, %c0_15, %c0_16] : memref<1x4x2x128xf32, #tpu.memory_space<vmem>>, vector<1x4x2x128xf32>
    %25 = vector.shape_cast %24 : vector<1x4x2x128xf32> to vector<4x2x128xf32>
    %26 = vector.shape_cast %23 : vector<4x2x128xf32> to vector<1x4x2x128xf32>
    tpu.vector_store %arg5[%c0_13, %c0_14, %c0_15, %c0_16], %26 {strides = array<i32>} : memref<1x4x2x128xf32, #tpu.memory_space<vmem>>, vector<1x4x2x128xf32>,
    return
  }
  func.func @transform_0(%arg0: i32, %arg1: i32) -> (i32, i32, i32, i32) {
    %c0_i32 = arith.constant 0 : i32
    %c0_i32_0 = arith.constant 0 : i32
    %c0_i32_1 = arith.constant 0 : i32
    return %arg0, %c0_i32, %arg1, %c0_i32_0 : i32, i32, i32, i32
  }
  func.func @transform_1(%arg0: i32, %arg1: i32) -> (i32, i32, i32) {
    %c0_i32 = arith.constant 0 : i32
    %c0_i32_0 = arith.constant 0 : i32
    %c0_i32_1 = arith.constant 0 : i32
    %c0_i32_2 = arith.constant 0 : i32
    return %c0_i32, %c0_i32_0, %c0_i32_1 : i32, i32, i32
  }
  func.func @transform_2(%arg0: i32, %arg1: i32) -> (i32, i32, i32) {
    %c0_i32 = arith.constant 0 : i32
    %c0_i32_0 = arith.constant 0 : i32
    %c0_i32_1 = arith.constant 0 : i32
    %c0_i32_2 = arith.constant 0 : i32
    return %c0_i32, %c0_i32_0, %c0_i32_1 : i32, i32, i32
  }
  func.func @transform_3(%arg0: i32, %arg1: i32) -> (i32, i32, i32, i32) {
    %c0_i32 = arith.constant 0 : i32
    %c0_i32_0 = arith.constant 0 : i32
    %c0_i32_1 = arith.constant 0 : i32
    return %arg0, %c0_i32, %arg1, %c0_i32_0 : i32, i32, i32, i32
  }
}

</mosaic_0001>

<bundles_post_ra>
// kernel: tpu_custom_call.1
= control target key start
LH: loop header
LB: loop body
LE: loop exit
PB: predicated region body
PF: predicated region fallthrough
CT: control target
= control target key end

     0   :  { %8 = vsyncpa [#allocation3], 0  ;;  %s882_s0 = inlined_call_operand.hbm [shape: f32[2,4,2,128], index: 0, kind: input, shape index: {}]   ;;  %s883_s1 = inlined_call_operand.vmem [shape: f32[4,1,1], index: 1, kind: input, shape index: {}]   ;;  %s884_s2 = inlined_call_operand.vmem [shape: f32[4,1,1], index: 2, kind: input, shape index: {}]   ;;  %s885_s3 = inlined_call_operand.hbm [shape: f32[2,4,2,128], index: 3, kind: output, shape index: {}]  }
   0x1   :  { %10 = vsyncpa [#allocation3 + $0x1], 0 }
   0x2   :  { %11 = vsyncpa [#allocation4], 0 }
   0x3   :  { %13 = vsyncpa [#allocation4 + $0x1], 0  ;;  %s671_s12 = smov 0   ;;  %s673_s13 = smov 0  }
   0x4   :  { %s675_s14 = smov 0   ;;  %s677_s15 = smov 0  }
   0x5   :  { %s679_s16 = smov 0   ;;  %s681_s17 = smov 0  }
   0x6 LB: > { %s434_s18 = sadd.s32 4294967295, %s642_s17   ;;  %s435_s19 = sadd.s32 4294967294, %s642_s17   ;;  %s642_s17 = sphi %s681_s17, %s19_s17   ;;  %s638_s16 = sphi %s679_s16, %s900_s16   ;;  %s634_s15 = sphi %s677_s15, %s899_s15   ;;  %s630_s14 = sphi %s675_s14, %s898_s14   ;;  %s626_s13 = sphi %s673_s13, %s897_s13   ;;  %s622_s12 = sphi %s671_s12, %s896_s12  }
   0x7   : > { %s31_s20 = sadd.s32 1, %s638_s16  ;;  %s40_s21 = sadd.s32 1, %s630_s14 }
   0x8   : > { %p33_p0 = scmp.ge.s32.totalorder %s31_s20, 2  ;;  %p47_p1 = scmp.ne.s32.totalorder %s630_s14, %s626_s13 }
   0x9   : > { %p48_p2 = scmp.eq.s32.totalorder %s642_s17, 0  ;;  %p53_p3 = scmp.ne.s32.totalorder %s626_s13, %s622_s12 }
   0xa   : > { %s902_s20 = smov (%p33_p0, %s31_s20), 0  ;;  %p54_p5 = scmp.eq.s32.totalorder %s434_s18, 0 }
   0xb   : > { %p712_p4 = por %p48_p2, %p47_p1  ;;  %s35_s23 = ssub.s32 %s638_s16, %s902_s20 }
   0xc   : > { %p121_p6 = scmp.eq.s32.totalorder %s434_s18, 1  ;;  %p38_p7 = scmp.eq.s32.totalorder %s35_s23, 0 }
   0xd   : > { %p718_p8 = por %p54_p5, %p53_p3  ;;  %p127_p10 = scmp.eq.s32.totalorder %s435_s19, 1 }
   0xe   : > { %p722_p9 = por %p121_p6, %p47_p1  ;;  %p471_p13 = scmp.lt.s32.totalorder %s642_s17, 2 }
   0xf   : > { %s727_s26 = scalar_select %p38_p7, %s630_s14, %s40_s21  }
  0x10   : > { %s889_s25 = scalar_select %p722_p9, 1, 0 }
  0x11   : > { %p729_p11 = por %p127_p10, %p53_p3  ;;  %s153_s28 = sand.u32 1, %s630_s14  }
  0x12   : > { %s438_s29 = sshll.u32 %s153_s28, 3  ;;  %s457_s30 = sshll.u32 %s638_s16, 7 }
  0x13   : > { %s890_s27 = scalar_select %p729_p11, 1, 0 }
  0x14   : > { %s740_s6 = scalar_lea.hbm %s882_s0, %s457_s30  ;;  %s157_s7 = scalar_lea.vmem [#allocation2], %s438_s29 }
  0x15   : > { %s165_s8 = sshll.u32 %s157_s7, 4  ;;  %p746_p0 = pnand %p471_p13, %p712_p4  ;;  %s742_s8 = int_to_ptr.vmem [resolvable:$true] %s165_s8 }
  0x16   : > { %s751_s10 = scalar_lea.sflag [#allocation3], %s153_s28  ;;  %s530_s11 = scalar_lea.hbm %s740_s6, 128 }
  0x17   : > { %p531_p2 = scmp.ne.s32.totalorder %s740_s6, %s530_s11  ;;  %p532_p3 = pneg %p746_p0 }
  0x18   : > { %s535_s21 = scalar_lea.hbm %s882_s0, 256  ;;  %p536_p4 = scmp.lt.u32.totalorder %s740_s6, %s882_s0 }
  0x19   : > { %p533_p5 = pnand %p532_p3, %p531_p2  ;;  %p537_p7 = scmp.lt.u32.totalorder %s535_s21, %s530_s11 }
  0x1a   : > { %p539_p13 = scmp.lt.u32.totalorder %s530_s11, %s740_s6 }
  0x1b   : > { %p534_p6 = pneg %p533_p5  ;;  %p538_p10 = por %p537_p7, %p536_p4 }
  0x1d   : > { %p540_p12 = por %p539_p13, %p538_p10 }
  0x1f   : > { %p541_p1 = pnand %p540_p12, %p534_p6 }
  0x21   : > { %544 = shalt.err (!%p541_p1)
}
  0x22   : > { %s545_s28 = scalar_lea.vmem %s742_s8, 128  ;;  %s644_s29 = smov [#allocation2]  }
  0x23   : > { %p546_p2 = scmp.ne.s32.totalorder %s742_s8, %s545_s28  ;;  %s550_s30 = sshll.u32 %s644_s29, 4  ;;  %s551_s30 = int_to_ptr.vmem [resolvable:$false] %s550_s30 }
  0x24   : > { %s552_s4 = scalar_lea.vmem %s551_s30, 256  ;;  %p553_p9 = scmp.lt.s32.totalorder %s742_s8, %s551_s30 }
  0x25   : > { %p548_p5 = pnand %p546_p2, %p532_p3  ;;  %p554_p4 = scmp.lt.s32.totalorder %s552_s4, %s545_s28 }
  0x27   : > { %p549_p11 = pneg %p548_p5  ;;  %p555_p7 = por %p554_p4, %p553_p9 }
  0x29   : > { %p556_p10 = pnand %p555_p7, %p549_p11 }
  0x2b   : > { %559 = shalt.err (!%p556_p10)
}
  0x2c   : > { %s645_s5 = smov 32   ;;  %s646_s7 = smov 2  }
  0x2d   : > { %466 = dma.hbm_to_vmem [thread:$0]  (!%p746_p0), %s740_s6, 128, %s742_s8, %s751_s10, %s645_s5, %s645_s5, %s646_s7  }
  0x2e   : > { %p173_p12 = scmp.lt.s32.totalorder %s642_s17, 3  ;;  %p892_p1 = scmp.ge.s32.totalorder %s642_s17, 1 }
  0x30   : > { %p174_p3 = pnand %p892_p1, %p173_p12 }
  0x31   : > { %s783_s11 = sand.u32 (!%p174_p3), 1, %s626_s13  }
  0x32   : > { %177 = sbr.rel (%p174_p3) target bundleno = 217 (0xd9), region = 32  ;;  %s442_s18 = sshll.u32 (!%p174_p3), %s783_s11, 3 }
  0x33   : > { %s180_s19 = scalar_lea.sflag (!%p174_p3), [#allocation3], %s783_s11  ;;  %s183_s21 = scalar_lea.vmem (!%p174_p3), [#allocation2], %s442_s18 }
  0x39   : > { %613 = dma.done.wait (%p718_p8), %s180_s19, 128  }
  0x3a   : > { %615 = vsyncadd (%p718_p8), %s180_s19, 4294967168  ;;  %v647_v0 = vmov 0   ;;  %v446_v1 = vld [vmem:[%s883_s1 + $0x2] ss:$0 sm:$0xff]  ;;  %v444_v2 = vld [vmem:[%s883_s1] ss:$0 sm:$0xff] }
  0x3b   : > { %527 = vset.pattern.permute.xlu1 %v647_v0  ;;  %526 = vset.pattern.permute.xlu0 %v647_v0  ;;  %v447_v3 = vld [vmem:[%s883_s1 + $0x3] ss:$0 sm:$0xff]  ;;  %v445_v4 = vld [vmem:[%s883_s1 + $0x1] ss:$0 sm:$0xff]  ;;  %v448_v6 = vld [vmem:[%s884_s2] ss:$0 sm:$0xff] }
  0x3c   : > { %279 = vperm.xlu1 %527, %v446_v1   ;;  %271 = vperm.xlu0 %526, %v444_v2   ;;  %v449_v5 = vld [vmem:[%s884_s2 + $0x1] ss:$0 sm:$0xff]  ;;  %v451_v7 = vld [vmem:[%s884_s2 + $0x3] ss:$0 sm:$0xff]  ;;  %v450_v8 = vld [vmem:[%s884_s2 + $0x2] ss:$0 sm:$0xff] }
  0x3d   : > { %vm218_vm0 = vcmask 1041408   ;;  %v206_v9 = vld [vmem:[%s183_s21] sm:$0x3]  ;;  %v207_v10 = vld [vmem:[%s183_s21 + $0x2] sm:$0x3]  ;;  %s458_s10 = sshll.u32 %s634_s15, 7 }
  0x3e   : > { %v219_v11 = vsel %vm218_vm0, %v206_v9, 0.0  ;;  %v220_v12 = vsel %vm218_vm0, %v207_v10, 0.0  ;;  %v208_v13 = vld [vmem:[%s183_s21 + $0x4] sm:$0x3]  ;;  %v209_v16 = vld [vmem:[%s183_s21 + $0x6] sm:$0x3]  ;;  %s833_s23 = scalar_lea.hbm %s885_s3, %s458_s10 }
  0x3f   : > { %v221_v14 = vadd.f32 %v220_v12, %v219_v11  ;;  %v222_v15 = vsel %vm218_vm0, %v208_v13, 0.0  ;;  %v224_v18 = vsel %vm218_vm0, %v209_v16, 0.0  ;;  %s205_s21 = scalar_lea.vmem [#allocation5], %s442_s18  ;;  %s335_s15 = scalar_lea.sflag [#allocation4], %s783_s11 }
  0x40   : > { %283 = vperm.xlu1 %527, %v447_v3   ;;  %275 = vperm.xlu0 %526, %v445_v4   ;;  %s349_s9 = sshll.u32 %s205_s21, 4  ;;  %p893_p9 = scmp.ne.s32.totalorder %s889_s25, 0  ;;  %s828_s9 = int_to_ptr.vmem [resolvable:$true] %s349_s9 }
  0x41   : > { %v223_v17 = vadd.f32 %v222_v15, %v221_v14  ;;  %s560_s28 = scalar_lea.vmem %s828_s9, 128  ;;  %s648_s24 = smov [#allocation5]  }
  0x42   : > { %p561_p8 = scmp.ne.s32.totalorder %s828_s9, %s560_s28  ;;  %s564_s29 = sshll.u32 %s648_s24, 4  ;;  %s565_s29 = int_to_ptr.vmem [resolvable:$false] %s564_s29 }
  0x43   : > { %v225_v19 = vadd.f32 %v224_v18, %v223_v17  ;;  %s566_s30 = scalar_lea.vmem %s565_s29, 256  ;;  %p567_p6 = scmp.lt.s32.totalorder %s828_s9, %s565_s29 }
  0x44   : > { %315 = vperm.xlu1 %527, %v449_v5   ;;  %311 = vperm.xlu0 %526, %v448_v6   ;;  %p562_p11 = pnand %p561_p8, %p893_p9  ;;  %p568_p13 = scmp.lt.s32.totalorder %s566_s30, %s560_s28 }
  0x45   : > { %v227_v20 = vmul.f32 0.25, %v225_v19 }
  0x46   : > { %p563_p0 = pneg %p562_p11  ;;  %p569_p2 = por %p568_p13, %p567_p6 }
  0x47   : > { %v228_v21 = vsub.f32 %v206_v9, %v227_v20  ;;  %v229_v22 = vsub.f32 %v207_v10, %v227_v20  ;;  %v230_v23 = vsub.f32 %v208_v13, %v227_v20  ;;  %v231_v26 = vsub.f32 %v209_v16, %v227_v20 }
  0x48   : > { %323 = vperm.xlu1 %527, %v451_v7   ;;  %319 = vperm.xlu0 %526, %v450_v8   ;;  %p570_p5 = pnand %p569_p2, %p563_p0 }
  0x49   : > { %v232_v24 = vmul.f32 %v228_v21, %v228_v21  ;;  %v233_v25 = vmul.f32 %v229_v22, %v229_v22  ;;  %v234_v27 = vmul.f32 %v230_v23, %v230_v23  ;;  %v235_v31 = vmul.f32 %v231_v26, %v231_v26 }
  0x4b   : > { %v236_v28 = vsel %vm218_vm0, %v232_v24, 0.0  ;;  %v237_v29 = vsel %vm218_vm0, %v233_v25, 0.0  ;;  %v239_v32 = vsel %vm218_vm0, %v234_v27, 0.0  ;;  %v241_v34 = vsel %vm218_vm0, %v235_v31, 0.0 }
  0x4c   : > { %v238_v30 = vadd.f32 %v237_v29, %v236_v28 }
  0x4e   : > { %v240_v33 = vadd.f32 %v239_v32, %v238_v30 }
  0x50   : > { %v242_v35 = vadd.f32 %v241_v34, %v240_v33 }
  0x52   : > { %v243_v36 = vmul.f32 0.25, %v242_v35 }
  0x54   : > { %v244_v37 = vadd.f32 1e-05, %v243_v36 }
  0x56   : > { %528 = vrsqrt.f32 %v244_v37 }
  0x60   : > { %v529_v38 = vpop.eup %528 }
  0x61   : > { %v246_v41 = vmul.f32 %v529_v38, %v228_v21  ;;  %v247_v42 = vmul.f32 %v529_v38, %v229_v22  ;;  %v248_v45 = vmul.f32 %v529_v38, %v230_v23  ;;  %v249_v47 = vmul.f32 %v529_v38, %v231_v26 }
  0xbb   : > { %v280_v39 = vpop.permute.xlu1 %279  ;;  %v272_v40 = vpop.permute.xlu0 %271 }
  0xbc   : > { %v286_v46 = vmul.f32 %v272_v40, %v246_v41  ;;  %v288_v53 = vmul.f32 %v280_v39, %v248_v45 }
  0xbf   : > { %v284_v43 = vpop.permute.xlu1 %283  ;;  %v276_v44 = vpop.permute.xlu0 %275 }
  0xc0   : > { %v287_v48 = vmul.f32 %v276_v44, %v247_v42  ;;  %v289_v54 = vmul.f32 %v284_v43, %v249_v47 }
  0xc3   : > { %v316_v49 = vpop.permute.xlu1 %315  ;;  %v312_v50 = vpop.permute.xlu0 %311 }
  0xc4   : > { %v327_v51 = vadd.f32 %v316_v49, %v287_v48  ;;  %v326_v52 = vadd.f32 %v312_v50, %v286_v46 }
  0xc6   : > { %331 = vst [vmem:[%s205_s21 + $0x2] sm:$0x3] %v327_v51  ;;  %330 = vst [vmem:[%s205_s21] sm:$0x3] %v326_v52 }
  0xc7   : > { %v324_v55 = vpop.permute.xlu1 %323  ;;  %v320_v56 = vpop.permute.xlu0 %319 }
  0xc8   : > { %v329_v57 = vadd.f32 %v324_v55, %v289_v54  ;;  %v328_v58 = vadd.f32 %v320_v56, %v288_v53 }
  0xca   : > { %333 = vst [vmem:[%s205_s21 + $0x6] sm:$0x3] %v329_v57  ;;  %332 = vst [vmem:[%s205_s21 + $0x4] sm:$0x3] %v328_v58 }
  0xcb   : > { %573 = shalt.err (!%p570_p5)
}
  0xcc   : > { %s574_s4 = scalar_lea.hbm %s833_s23, 128  ;;  %s578_s19 = scalar_lea.hbm %s885_s3, 256 }
  0xcd   : > { %p575_p4 = scmp.ne.s32.totalorder %s833_s23, %s574_s4  ;;  %p579_p12 = scmp.lt.u32.totalorder %s833_s23, %s885_s3 }
  0xce   : > { %p580_p1 = scmp.lt.u32.totalorder %s578_s19, %s574_s4  ;;  %p582_p8 = scmp.lt.u32.totalorder %s574_s4, %s833_s23 }
  0xcf   : > { %p576_p7 = pnand %p575_p4, %p893_p9 }
  0xd0   : > { %p581_p3 = por %p580_p1, %p579_p12 }
  0xd1   : > { %p577_p10 = pneg %p576_p7 }
  0xd2   : > { %p583_p11 = por %p582_p8, %p581_p3 }
  0xd4   : > { %p584_p0 = pnand %p583_p11, %p577_p10 }
  0xd6   : > { %587 = shalt.err (!%p584_p0)
}
  0xd7   : > { %s649_s21 = smov 32   ;;  %s650_s10 = smov 2  }
  0xd8   : > { %461 = dma.vmem_to_hbm [thread:$0]  (%p893_p9), %s828_s9, 128, %s833_s23, %s335_s15, %s649_s21, %s649_s21, %s650_s10  }
  0xd9 PF: > { %s364_s18 = sand.u32 1, %s622_s12   ;;  %p894_p6 = scmp.ne.s32.totalorder %s890_s27, 0 }
  0xda   : > { %p895_p13 = scmp.ge.s32.totalorder %s642_s17, 2  ;;  %s365_s22 = scalar_lea.sflag [#allocation4], %s364_s18 }
  0xdc   : > { %p468_p2 = pnand %p895_p13, %p894_p6 }
  0xde   : > { %617 = dma.done.wait (!%p468_p2), %s365_s22, 128  }
  0xdf   : > { %619 = vsyncadd (!%p468_p2), %s365_s22, 4294967168  ;;  %s19_s17 = sadd.s32 1, %s642_s17   ;;  %s896_s12 = smov %s626_s13 }
  0xe0   : > { %p16_p5 = scmp.ge.s32.totalorder %s19_s17, 4   ;;  %s897_s13 = smov %s630_s14 }
  0xe1   : > { %s898_s14 = smov %s727_s26  ;;  %s899_s15 = smov %s638_s16 }
  0xe2   : > { %s900_s16 = smov %s902_s20  ;;  %18 = sbr.rel (!%p16_p5) target bundleno = 6 (0x6), region = 77 }
  0xe9   :  { %370 = vsyncpa [#allocation3], 1 }
  0xea   :  { %372 = vsyncpa [#allocation3 + $0x1], 1 }
  0xeb   :  { %373 = vsyncpa [#allocation4], 1 }
  0xec   :  { %375 = vsyncpa [#allocation4 + $0x1], 1 }

</bundles_post_ra>
